<compile_context>
chip_gen: v5e
topology: v5e:2x2
jax: 0.10.0
libtpu: 0.0.40
codegen_flags: <defaults>
</compile_context>

<pallas_src>
import functools

import jax
import jax.numpy as jnp
from jax import lax
from jax.experimental import pallas as pl
from jax.experimental.pallas import tpu as pltpu


def _spatial_gather_kernel(lse_ref, probs_ref, feat_ref, out_ref, acc_ref, *,
                           scale):
    """One (batch, c-tile, hw-tile) grid step.

    lse_ref:   (K, 1)    f32  -- logsumexp(scale*probs) over HW (wrapper-side)
    probs_ref: (K, THW)       -- one spatial tile of raw probs
    feat_ref:  (TC, THW)      -- one spatial tile of one C-tile of features
    out_ref:   (K, TC)        -- lane-dense output block (written at last step)
    acc_ref:   (K, TC)   f32  -- accumulator, resident across hw steps
    """
    hw = pl.program_id(2)

    @pl.when(hw == 0)
    def _init():
        acc_ref[...] = jnp.zeros_like(acc_ref)

    # Normalized softmax weights for this spatial tile; the global denominator
    # is folded into lse so no finalize-normalization is needed.
    p = probs_ref[...].astype(jnp.float32)                       # (K, THW)
    e = jnp.exp(scale * p - lse_ref[...])                        # (K, THW)

    feats = feat_ref[...]                                        # (TC, THW)
    # (K, TC) += e . feats^T: contract the shared last (lane) axis directly,
    # no transpose of the feature tile is materialized.
    acc_ref[...] += lax.dot_general(
        e.astype(feats.dtype), feats,
        dimension_numbers=(((1,), (1,)), ((), ())),
        preferred_element_type=jnp.float32)

    @pl.when(hw == pl.num_programs(2) - 1)
    def _finalize():
        out_ref[...] = acc_ref[...].astype(out_ref.dtype)


def _vmem_cap_bytes():
    """~75% of this generation's physical VMEM (64 MiB v7x, 128 MiB v5e/v6e)."""
    try:
        cap = int(pltpu.get_tpu_info().vmem_capacity_bytes)
    except Exception:
        cap = 64 << 20                      # conservative: v7x physical VMEM
    return (cap * 3) // 4


def _choose_c_tile(C, B):
    """Split C across a parallel grid axis when the batch alone cannot occupy
    both v7x TensorCores.  Harmless on single-TC v5e/v6e."""
    if B >= 2 or C < 256 or C % 256 != 0:
        return C
    return C // 2


def _choose_spatial_tile(hw, c_tile, itemsize, target_bytes):
    """Spatial tile: a multiple of 128 keeping the per-buffer feature tile
    <= target_bytes, or the full HW when a single block fits."""
    target_elems = max(
        128, ((target_bytes // max(1, c_tile * itemsize)) // 128) * 128)
    if hw <= target_elems:
        return hw                        # single full-HW block per (b, c)
    return target_elems                  # HW gets padded up to a multiple


def spatial_gather(features, probs, scale=1.0, spatial_tile=None,
                   tile_target_bytes=8 * 1024 * 1024):
    """features: (B, C, H, W), probs: (B, K, H, W) -> (B, C, K, 1)."""
    B, C, H, W = features.shape
    Bp, K, Hp, Wp = probs.shape
    assert (B, H, W) == (Bp, Hp, Wp)
    HW = H * W

    feat2d = features.reshape(B, C, HW)
    probs2d = probs.reshape(B, K, HW)

    # Global softmax log-normalizer computed once in the wrapper (probs is tiny
    # vs features), so the kernel never needs a resident (K, HW) block.
    s = scale * probs2d.astype(jnp.float32)
    m = jnp.max(s, axis=-1, keepdims=True)
    lse = m + jnp.log(jnp.sum(jnp.exp(s - m), axis=-1, keepdims=True))  # (B,K,1)

    itemsize = features.dtype.itemsize
    c_tile = _choose_c_tile(C, B)
    if spatial_tile is None:
        thw = _choose_spatial_tile(HW, c_tile, itemsize, tile_target_bytes)
    else:
        thw = int(spatial_tile)
    assert thw == HW or thw % 128 == 0, (
        "spatial_tile must be a multiple of 128 (or the full H*W)", thw, HW)

    # Pad HW up to a multiple of the spatial tile.  Padded feature columns are
    # zero (contribute nothing to the matmul); padded probs columns are zero
    # (finite exp, multiplied by zero features); lse was computed on the
    # unpadded probs, so the result is exact.
    HW_pad = ((HW + thw - 1) // thw) * thw
    if HW_pad != HW:
        pad = HW_pad - HW
        feat2d = jnp.pad(feat2d, ((0, 0), (0, 0), (0, pad)))
        probs2d = jnp.pad(probs2d, ((0, 0), (0, 0), (0, pad)))
    n_hw = HW_pad // thw
    n_c = C // c_tile

    # VMEM budget: double-buffered pipeline blocks + scratch + in-kernel f32
    # temporaries, capped at ~75% of this generation's physical VMEM.
    pbytes = probs.dtype.itemsize
    need = (2 * c_tile * thw * itemsize             # feature tiles (x2 bufs)
            + 2 * K * thw * pbytes                  # probs tiles  (x2 bufs)
            + 2 * K * max(c_tile, 128) * itemsize   # output block (x2 bufs)
            + K * max(c_tile, 128) * 4              # f32 accumulator scratch
            + 2 * K * thw * 4                       # in-kernel f32 temporaries
            + 2 * K * 128 * 4                       # lse block
            + (2 << 20))                            # headroom
    vmem_limit = int(min(_vmem_cap_bytes(), max(16 << 20, need)))

    kernel = functools.partial(_spatial_gather_kernel, scale=float(scale))

    out = pl.pallas_call(
        kernel,
        out_shape=jax.ShapeDtypeStruct((B, K, C), features.dtype),
        grid_spec=pltpu.PrefetchScalarGridSpec(
            num_scalar_prefetch=0,
            grid=(B, n_c, n_hw),
            in_specs=[
                # lse: one tiny (K, 1) block, constant across c/hw.
                pl.BlockSpec((None, K, 1), lambda b, c, hw: (b, 0, 0)),
                # probs: one (K, THW) spatial tile per hw step.
                pl.BlockSpec((None, K, thw), lambda b, c, hw: (b, 0, hw)),
                # features: one (TC, THW) tile per (c, hw) step.
                pl.BlockSpec((None, c_tile, thw), lambda b, c, hw: (b, c, hw)),
            ],
            # Lane-dense (K, TC) output block, revisited across the hw axis.
            out_specs=pl.BlockSpec((None, K, c_tile),
                                   lambda b, c, hw: (b, 0, c)),
            scratch_shapes=[
                pltpu.VMEM((K, c_tile), jnp.float32),   # accumulator
            ],
        ),
        compiler_params=pltpu.CompilerParams(
            dimension_semantics=("parallel", "parallel", "arbitrary"),
            vmem_limit_bytes=vmem_limit,
        ),
        cost_estimate=pl.CostEstimate(
            flops=2 * B * K * C * HW_pad,
            transcendentals=B * K * HW_pad,
            bytes_accessed=(B * C * HW_pad * itemsize       # features read
                            + B * K * HW_pad * pbytes       # probs read
                            + B * K * 4                     # lse read
                            + B * K * C * itemsize),        # output write
        ),
    )(lse, probs2d, feat2d)

    # (B, K, C) -> (B, C, K, 1)  (matches torch permute(0, 2, 1).unsqueeze(-1))
    return jnp.transpose(out, (0, 2, 1))[..., None]


def _reference(features, probs, scale=1.0):
    B, K, H, W = probs.shape
    C = features.shape[1]
    p = jax.nn.softmax(scale * probs.reshape(B, K, -1).astype(jnp.float32),
                       axis=2)                                     # (B, K, HW)
    f = features.reshape(B, C, -1).astype(jnp.float32).transpose(0, 2, 1)
    ctx = jnp.einsum("bkn,bnc->bkc", p, f)                         # (B, K, C)
    return ctx.transpose(0, 2, 1)[..., None].astype(features.dtype)


if __name__ == "__main__":
    key = jax.random.PRNGKey(0)
    kf, kp, kf2, kp2, kf3, kp3 = jax.random.split(key, 6)

    # 1) Multi-tile spatial path: HW=256 split into two 128-wide tiles
    #    (exercises accumulator init / finalize).
    B, C, K, H, W = 2, 4, 4, 16, 16
    feats = jax.random.normal(kf, (B, C, H, W), dtype=jnp.float32)
    probs = jax.random.normal(kp, (B, K, H, W), dtype=jnp.float32)
    out = jax.block_until_ready(
        spatial_gather(feats, probs, scale=1.0, spatial_tile=128))
    ref = _reference(feats, probs, scale=1.0)
    assert out.shape == (B, C, K, 1), out.shape
    assert jnp.allclose(out, ref, atol=1e-4, rtol=1e-4), "tiled mismatch"

    # 2) Automatic tile selection (single full-HW block) + non-default scale.
    out = jax.block_until_ready(spatial_gather(feats, probs, scale=0.5))
    ref = _reference(feats, probs, scale=0.5)
    assert jnp.allclose(out, ref, atol=1e-4, rtol=1e-4), "auto mismatch"

    # 3) Padded-HW path: HW=144 is not a multiple of the 128-wide tile.
    H2 = W2 = 12
    feats2 = jax.random.normal(kf2, (B, C, H2, W2), dtype=jnp.float32)
    probs2 = jax.random.normal(kp2, (B, K, H2, W2), dtype=jnp.float32)
    out2 = jax.block_until_ready(
        spatial_gather(feats2, probs2, scale=1.0, spatial_tile=128))
    ref2 = _reference(feats2, probs2, scale=1.0)
    assert jnp.allclose(out2, ref2, atol=1e-4, rtol=1e-4), "padded mismatch"

    # 4) B=1, C=256: exercises the C-parallel axis (dual-TC occupancy on v7x).
    feats3 = jax.random.normal(kf3, (1, 256, H, W), dtype=jnp.float32)
    probs3 = jax.random.normal(kp3, (1, K, H, W), dtype=jnp.float32)
    out3 = jax.block_until_ready(
        spatial_gather(feats3, probs3, scale=1.0, spatial_tile=128))
    ref3 = _reference(feats3, probs3, scale=1.0)
    assert out3.shape == (1, 256, K, 1), out3.shape
    assert jnp.allclose(out3, ref3, atol=1e-4, rtol=1e-4), "c-tiled mismatch"

    print("KERNEL_OK")
</pallas_src>

<mosaic_0001>
module attributes {stable_mosaic.version = 11 : i64} {
  func.func @_spatial_gather_kernel(%arg0: i32, %arg1: i32, %arg2: i32, %arg3: memref<1x4x1xf32, #tpu.memory_space<vmem>>, %arg4: memref<1x4x128xf32, #tpu.memory_space<vmem>>, %arg5: memref<1x4x128xf32, #tpu.memory_space<vmem>>, %arg6: memref<1x4x4xf32, #tpu.memory_space<vmem>>, %arg7: memref<4x4xf32, #tpu.memory_space<vmem>>) attributes {dimension_semantics = [#tpu.dimension_semantics<parallel>, #tpu.dimension_semantics<parallel>, #tpu.dimension_semantics<arbitrary>], iteration_bounds = array<i64: 2, 1, 2>, scalar_prefetch = 0 : i64, scratch_operands = 1 : i64, tpu.core_type = #tpu.core_type<tc>, window_params = [{transform_indices = @transform_0, window_bounds = array<i64: 1, 4, 1>}, {transform_indices = @transform_1, window_bounds = array<i64: 1, 4, 128>}, {transform_indices = @transform_2, window_bounds = array<i64: 1, 4, 128>}, {transform_indices = @transform_3, window_bounds = array<i64: 1, 4, 4>}]} {
    %c0_i32 = arith.constant 0 : i32
    %0 = arith.cmpi eq, %arg2, %c0_i32 : i32
    %1 = arith.extui %0 : i1 to i32
    %c0_i32_0 = arith.constant 0 : i32
    %2 = arith.cmpi ne, %1, %c0_i32_0 : i32
    scf.if %2 {
      %cst_15 = arith.constant 0.000000e+00 : f32
      %21 = vector.broadcast %cst_15 : f32 to vector<4x4xf32>
      %c0_16 = arith.constant 0 : index
      %c0_17 = arith.constant 0 : index
      %22 = vector.load %arg7[%c0_16, %c0_17] : memref<4x4xf32, #tpu.memory_space<vmem>>, vector<4x4xf32>
      tpu.vector_store %arg7[%c0_16, %c0_17], %21 {strides = array<i32>} : memref<4x4xf32, #tpu.memory_space<vmem>>, vector<4x4xf32>,
    } else {
    }
    %c0 = arith.constant 0 : index
    %c0_1 = arith.constant 0 : index
    %c0_2 = arith.constant 0 : index
    %3 = vector.load %arg4[%c0, %c0_1, %c0_2] : memref<1x4x128xf32, #tpu.memory_space<vmem>>, vector<1x4x128xf32>
    %4 = vector.shape_cast %3 : vector<1x4x128xf32> to vector<4x128xf32>
    %cst = arith.constant 1.000000e+00 : f32
    %5 = vector.broadcast %cst : f32 to vector<4x128xf32>
    %6 = arith.mulf %5, %4 : vector<4x128xf32>
    %c0_3 = arith.constant 0 : index
    %c0_4 = arith.constant 0 : index
    %c0_5 = arith.constant 0 : index
    %7 = vector.load %arg3[%c0_3, %c0_4, %c0_5] : memref<1x4x1xf32, #tpu.memory_space<vmem>>, vector<1x4x1xf32>
    %8 = vector.shape_cast %7 : vector<1x4x1xf32> to vector<4x1xf32>
    %9 = vector.broadcast %8 : vector<4x1xf32> to vector<4x128xf32>
    %10 = arith.subf %6, %9 : vector<4x128xf32>
    %11 = math.exp %10 : vector<4x128xf32>
    %c0_6 = arith.constant 0 : index
    %c0_7 = arith.constant 0 : index
    %c0_8 = arith.constant 0 : index
    %12 = vector.load %arg5[%c0_6, %c0_7, %c0_8] : memref<1x4x128xf32, #tpu.memory_space<vmem>>, vector<1x4x128xf32>
    %13 = vector.shape_cast %12 : vector<1x4x128xf32> to vector<4x128xf32>
    %c0_9 = arith.constant 0 : index
    %c0_10 = arith.constant 0 : index
    %14 = vector.load %arg7[%c0_9, %c0_10] : memref<4x4xf32, #tpu.memory_space<vmem>>, vector<4x4xf32>
    %cst_11 = arith.constant dense<0.000000e+00> : vector<4x4xf32>
    %15 = tpu.matmul %11, %13, %cst_11 {dimension_numbers = #tpu.dot_dimension_numbers<[1], [1], [0], [0], [0, 0, 1, 0], [], []>} : vector<4x128xf32>, vector<4x128xf32>, vector<4x4xf32> -> vector<4x4xf32>
    %16 = arith.addf %14, %15 : vector<4x4xf32>
    %c0_12 = arith.constant 0 : index
    %c0_13 = arith.constant 0 : index
    %17 = vector.load %arg7[%c0_12, %c0_13] : memref<4x4xf32, #tpu.memory_space<vmem>>, vector<4x4xf32>
    tpu.vector_store %arg7[%c0_12, %c0_13], %16 {strides = array<i32>} : memref<4x4xf32, #tpu.memory_space<vmem>>, vector<4x4xf32>,
    %c1_i32 = arith.constant 1 : i32
    %18 = arith.cmpi eq, %arg2, %c1_i32 : i32
    %19 = arith.extui %18 : i1 to i32
    %c0_i32_14 = arith.constant 0 : i32
    %20 = arith.cmpi ne, %19, %c0_i32_14 : i32
    scf.if %20 {
      %c0_15 = arith.constant 0 : index
      %c0_16 = arith.constant 0 : index
      %21 = vector.load %arg7[%c0_15, %c0_16] : memref<4x4xf32, #tpu.memory_space<vmem>>, vector<4x4xf32>
      %c0_17 = arith.constant 0 : index
      %c0_18 = arith.constant 0 : index
      %c0_19 = arith.constant 0 : index
      %22 = vector.load %arg6[%c0_17, %c0_18, %c0_19] : memref<1x4x4xf32, #tpu.memory_space<vmem>>, vector<1x4x4xf32>
      %23 = vector.shape_cast %22 : vector<1x4x4xf32> to vector<4x4xf32>
      %24 = vector.shape_cast %21 : vector<4x4xf32> to vector<1x4x4xf32>
      tpu.vector_store %arg6[%c0_17, %c0_18, %c0_19], %24 {strides = array<i32>} : memref<1x4x4xf32, #tpu.memory_space<vmem>>, vector<1x4x4xf32>,
    } else {
    }
    return
  }
  func.func @transform_0(%arg0: i32, %arg1: i32, %arg2: i32) -> (i32, i32, i32) {
    %c0_i32 = arith.constant 0 : i32
    %c0_i32_0 = arith.constant 0 : i32
    %c0_i32_1 = arith.constant 0 : i32
    return %arg0, %c0_i32, %c0_i32_0 : i32, i32, i32
  }
  func.func @transform_1(%arg0: i32, %arg1: i32, %arg2: i32) -> (i32, i32, i32) {
    %c0_i32 = arith.constant 0 : i32
    %c0_i32_0 = arith.constant 0 : i32
    return %arg0, %c0_i32, %arg2 : i32, i32, i32
  }
  func.func @transform_2(%arg0: i32, %arg1: i32, %arg2: i32) -> (i32, i32, i32) {
    %c0_i32 = arith.constant 0 : i32
    return %arg0, %arg1, %arg2 : i32, i32, i32
  }
  func.func @transform_3(%arg0: i32, %arg1: i32, %arg2: i32) -> (i32, i32, i32) {
    %c0_i32 = arith.constant 0 : i32
    %c0_i32_0 = arith.constant 0 : i32
    return %arg0, %c0_i32, %arg1 : i32, i32, i32
  }
}

</mosaic_0001>

<bundles_post_ra>
// kernel: tpu_custom_call.1
= control target key start
LH: loop header
LB: loop body
LE: loop exit
PB: predicated region body
PF: predicated region fallthrough
CT: control target
= control target key end

     0   :  { %s1009_s0 = inlined_call_operand.vmem [shape: f32[2,4,1], index: 0, kind: input, shape index: {}]   ;;  %s1010_s1 = inlined_call_operand.hbm [shape: f32[2,4,256], index: 1, kind: input, shape index: {}]   ;;  %s1011_s2 = inlined_call_operand.hbm [shape: f32[2,4,256], index: 2, kind: input, shape index: {}]   ;;  %s1012_s3 = inlined_call_operand.hbm [shape: f32[2,4,4], index: 3, kind: output, shape index: {}]  }
   0x1   :  { %1017 = sst [smem:[#allocation17_spill]] %s1010_s1 }
   0x2   :  { %8 = vsyncpa [#allocation4], 0 }
   0x3   :  { %10 = vsyncpa [#allocation4 + $0x1], 0 }
   0x4   :  { %11 = vsyncpa [#allocation7], 0 }
   0x5   :  { %13 = vsyncpa [#allocation7 + $0x1], 0 }
   0x6   :  { %14 = vsyncpa [#allocation5], 0 }
   0x7   :  { %16 = vsyncpa [#allocation5 + $0x1], 0  ;;  %s810_s12 = smov 0   ;;  %s812_s13 = smov 0  }
   0x8   :  { %s814_s14 = smov 0   ;;  %s816_s15 = smov 0  }
   0x9   :  { %s818_s16 = smov 0   ;;  %s820_s17 = smov 0  }
   0xa   :  { %s822_s18 = smov 0   ;;  %s824_s19 = smov 0  }
   0xb   :  { %s826_s20 = smov 0   ;;  %s828_s21 = smov 0  }
   0xc   :  { %s830_s22 = smov 0  }
   0xd LB: > { %1018 = sst [smem:[#allocation12_spill]] %s778_s20  ;;  %s467_s23 = sadd.s32 4294967295, %s786_s22   ;;  %s786_s22 = sphi %s830_s22, %s22_s22   ;;  %s782_s21 = sphi %s828_s21, %s1033_s21   ;;  %s778_s20 = sphi %s826_s20, %s1032_s20   ;;  %s774_s19 = sphi %s824_s19, %s1031_s19   ;;  %s770_s18 = sphi %s822_s18, %s1030_s18   ;;  %s766_s17 = sphi %s820_s17, %s1039_s17   ;;  %s762_s16 = sphi %s818_s16, %s1038_s16   ;;  %s758_s15 = sphi %s816_s15, %s1037_s15   ;;  %s754_s14 = sphi %s814_s14, %s1036_s14   ;;  %s750_s13 = sphi %s812_s13, %s1035_s13   ;;  %s746_s12 = sphi %s810_s12, %s1034_s12  }
   0xe   : > { %1019 = sst [smem:[#allocation13_spill]] %s782_s21  ;;  %s468_s24 = sadd.s32 4294967294, %s786_s22  }
   0xf   : > { %s34_s25 = sadd.s32 1, %s778_s20  ;;  %s41_s26 = sadd.s32 1, %s782_s21 }
  0x10   : > { %p35_p0 = scmp.ge.s32.totalorder %s34_s25, 2  ;;  %s76_s27 = sadd.s32 1, %s766_s17 }
  0x11   : > { %p83_p1 = scmp.ne.s32.totalorder %s766_s17, %s762_s16  ;;  %p84_p2 = scmp.eq.s32.totalorder %s786_s22, 0 }
  0x12   : > { %s1041_s25 = smov (%p35_p0, %s34_s25), 0  ;;  %s1043_s26 = smov (!%p35_p0, %s41_s26), %s782_s21 }
  0x13   : > { %1020 = sst [smem:[#allocation14_spill]] %s1041_s25  ;;  %s72_s28 = ssub.s32 %s778_s20, %s1041_s25 }
  0x14   : > { %p876_p3 = por %p84_p2, %p83_p1  ;;  %p43_p4 = scmp.ge.s32.totalorder %s1043_s26, 2 }
  0x15   : > { %p89_p5 = scmp.ne.s32.totalorder %s762_s16, %s758_s15  ;;  %p90_p6 = scmp.eq.s32.totalorder %s467_s23, 0 }
  0x16   : > { %s134_s30 = sadd.s32 1, %s754_s14  ;;  %s1045_s26 = smov (%p43_p4, %s1043_s26), 0 }
  0x17   : > { %1022 = sst [smem:[#allocation15_spill]] %s1045_s26  ;;  %p884_p7 = por %p90_p6, %p89_p5 }
  0x18   : > { %p144_p8 = scmp.ne.s32.totalorder %s754_s14, %s750_s13  ;;  %s71_s5 = ssub.s32 %s782_s21, %s1045_s26 }
  0x19   : > { %p145_p9 = scmp.eq.s32.totalorder %s467_s23, 3  ;;  %s73_s6 = sor.u32 %s72_s28, %s71_s5 }
  0x1a   : > { %p132_p10 = scmp.eq.s32.totalorder %s71_s5, 0  ;;  %p74_p11 = scmp.eq.s32.totalorder %s73_s6, 0 }
  0x1b   : > { %p892_p12 = por %p145_p9, %p144_p8  ;;  %p150_p13 = scmp.ne.s32.totalorder %s750_s13, %s746_s12 }
  0x1c   : > { %s897_s8 = scalar_select %p132_p10, %s754_s14, %s134_s30  }
  0x1d   : > { %s900_s9 = scalar_select %p74_p11, %s766_s17, %s76_s27  }
  0x1e   : > { %p151_p0 = scmp.eq.s32.totalorder %s468_s24, 3  ;;  %p505_p1 = scmp.lt.s32.totalorder %s786_s22, 4 }
  0x1f   : > { %1025 = sst [smem:[#allocation16_spill]] %s900_s9  ;;  %s178_s11 = sand.u32 1, %s766_s17  }
  0x20   : > { %p905_p2 = por %p151_p0, %p150_p13  ;;  %s471_s15 = sshll.u32 %s178_s11, 2 }
  0x21   : > { %s472_s23 = sshll.u32 %s782_s21, 1  ;;  %s182_s5 = scalar_lea.vmem [#allocation3], %s471_s15 }
  0x22   : > { %s186_s28 = sadd.s32 %s778_s20, %s472_s23  ;;  %s192_s6 = sshll.u32 %s182_s5, 4  ;;  %s193_s6 = int_to_ptr.vmem [resolvable:$true] %s192_s6 }
  0x23   : > { %s473_s26 = sshll.u32 %s186_s28, 2  ;;  %s1027_s1 = sld [smem:[#allocation17_spill]] }
  0x24   : > { %p917_p4 = pnand %p505_p1, %p876_p3  ;;  %p477_p5 = scmp.ge.s32.totalorder %s786_s22, 1 }
  0x25   : > { %s179_s21 = scalar_lea.sflag [#allocation4], %s178_s11  ;;  %p220_p6 = scmp.lt.s32.totalorder %s786_s22, 5 }
  0x26   : > { %s211_s5 = scalar_lea.hbm %s1011_s2, %s473_s26  ;;  %s203_s29 = scalar_lea.vmem [#allocation6], %s471_s15 }
  0x27   : > { %p221_p8 = pnand %p477_p5, %p220_p6  ;;  %s213_s30 = sshll.u32 %s211_s5, 4  ;;  %s214_s30 = int_to_ptr.hbm [resolvable:$true] %s213_s30 }
  0x28   : > { %s215_s27 = sshll.u32 %s203_s29, 4  ;;  %s216_s27 = int_to_ptr.vmem [resolvable:$true] %s215_s27 }
  0x29   : > { %s188_s25 = scalar_lea.hbm %s1027_s1, %s473_s26  ;;  %s200_s1 = scalar_lea.sflag [#allocation7], %s178_s11 }
  0x2a   : > { %s190_s9 = sshll.u32 %s188_s25, 4  ;;  %224 = sbr.rel (%p221_p8) target bundleno = 341 (0x155), region = 32  ;;  %s191_s9 = int_to_ptr.hbm [resolvable:$true] %s190_s9 }
  0x2b   : > { %497 = dma.hbm_to_vmem [thread:$0]  (!%p917_p4), %s191_s9, 64, %s193_s6, %s179_s21  }
  0x2c   : > { %500 = dma.hbm_to_vmem [thread:$0]  (!%p917_p4), %s214_s30, 64, %s216_s27, %s200_s1  }
  0x2d   : > { %s226_s25 = sand.u32 (!%p221_p8), 1, %s762_s16  }
  0x2e   : > { %s478_s20 = sshll.u32 (!%p221_p8), %s226_s25, 2  ;;  %s227_s21 = scalar_lea.sflag (!%p221_p8), [#allocation4], %s226_s25 }
  0x2f   : > { %s230_s9 = scalar_lea.vmem [#allocation3], %s478_s20 }
  0x30   : > { %733 = dma.done.wait (%p884_p7), %s227_s21, 64  }
  0x31   : > { %735 = vsyncadd (%p884_p7), %s227_s21, 4294967232  ;;  %s237_s26 = scalar_lea.sflag [#allocation7], %s226_s25  ;;  %s240_s15 = scalar_lea.vmem [#allocation6], %s478_s20 }
  0x32   : > { %737 = dma.done.wait (%p884_p7), %s237_s26, 64  }
  0x33   : > { %739 = vsyncadd (%p884_p7), %s237_s26, 4294967232  ;;  %s270_s1 = sand.u32 1, %s750_s13   ;;  %p273_p3 = scmp.lt.s32.totalorder %s774_s19, 1 }
  0x34   : > { %s943_s11 = sshll.u32 %s270_s1, 2  ;;  %p482_p9 = scmp.ne.s32.totalorder %s770_s18, 0 }
  0x35   : > { %s274_s6 = scalar_select %p273_p3, %s774_s19, 1 }
  0x36   : > { %s272_s5 = scalar_lea.vmem [#allocation8], %s943_s11  ;;  %280 = sbr.rel (%p482_p9) target bundleno = 61 (0x3d), region = 44 }
  0x37   : > { %s481_s24 = sshll.u32 %s274_s6, 2 }
  0x38   : > { %s276_s20 = scalar_lea.vmem %s1009_s0, %s481_s24 }
  0x3b   : > { %vm281_vm0 = vcmask 27648   ;;  %v788_v0 = vmov 0.0  }
  0x3c   : > { %282 = vst.msk [vmem:[#allocation2] sm:$0xf] %vm281_vm0, %v788_v0 }
  0x3d PF: > { %v284_v1 = vld [vmem:[%s276_s20] sm:$0xf]  ;;  %v789_v2 = vmov 0   ;;  %v293_v3 = vld [vmem:[%s240_s15] sm:$0xf]  ;;  %vm316_vm1 = vcmask 27648  }
  0x3e   : > { %597 = vset.pattern.permute.xlu0 %v789_v2  ;;  %310 = vmatpush.xpose.msra.mxu0 %v293_v3  ;;  %v283_v4 = vld [vmem:[%s230_s9] sm:$0xf]  ;;  %p483_p7 = scmp.ne.s32.totalorder %s770_s18, 1 }
  0x3f   : > { %287 = vperm.xlu0 %597, %v284_v1  }
  0x43   : > { %v294_v9 = vld [vmem:[#allocation2] sm:$0xf] }
  0xb1   : > { %v288_v5 = vpop.permute.xlu0 %287 }
  0xb2   : > { %v290_v6 = vsub.f32 %v283_v4, %v288_v5 }
  0xb4   : > { %v291_v7 = vmul.f32 1.442695, %v290_v6 }
  0xb6   : > { %598 = vpow2.f32 %v291_v7 }
  0xbc   : > { %v599_v8 = vpop.eup %598 }
  0xbd   : > { %311 = vmatmul.f32.vlgmr.msra.gmra.mxu0 %v599_v8 }
 0x139   : > { %321 = sbr.rel (%p483_p7) target bundleno = 326 (0x146), region = 48 }
 0x13a   : > { %v312_v10 = vpop.f32.mrf.mxu0 }
 0x13b   : > { %v315_v11 = vadd.f32 %v312_v10, %v294_v9 }
 0x13d   : > { %317 = vst.msk [vmem:[#allocation2] sm:$0xf] %vm316_vm1, %v315_v11 }
 0x144   : > { %v322_v12 = vld [vmem:[#allocation2] sm:$0xf] }
 0x145   : > { %323 = vst.msk [vmem:[%s272_s5] sm:$0xf] %vm316_vm1, %v322_v12 }
 0x146 PF: > { %s485_s4 = sshll.u32 %s774_s19, 2  ;;  %s338_s25 = sshll.u32 %s272_s5, 4  ;;  %s339_s25 = int_to_ptr.vmem [resolvable:$true] %s338_s25 }
 0x147   : > { %s336_s27 = scalar_lea.hbm %s1012_s3, %s485_s4  ;;  %s325_s18 = scalar_lea.sflag [#allocation5], %s270_s1 }
 0x148   : > { %s340_s21 = sshll.u32 %s336_s27, 4  ;;  %s680_s6 = scalar_lea.hbm %s1012_s3, 8  ;;  %s341_s21 = int_to_ptr.hbm [resolvable:$true] %s340_s21 }
 0x149   : > { %s674_s9 = sshra.s32 %s341_s21, 4  ;;  %s675_s9 = int_to_ptr.hbm [resolvable:$true] %s674_s9 }
 0x14a   : > { %s676_s26 = scalar_lea.hbm %s675_s9, 4  ;;  %p681_p0 = scmp.lt.s32.totalorder %s675_s9, %s1012_s3 }
 0x14b   : > { %p677_p10 = scmp.ne.s32.totalorder %s675_s9, %s676_s26  ;;  %p682_p1 = scmp.lt.s32.totalorder %s680_s6, %s676_s26 }
 0x14d   : > { %p678_p11 = pnand %p677_p10, %p892_p12  ;;  %p683_p4 = por %p682_p1, %p681_p0 }
 0x14f   : > { %p679_p13 = pneg %p678_p11 }
 0x151   : > { %p684_p5 = pnand %p683_p4, %p679_p13 }
 0x153   : > { %687 = shalt.err (!%p684_p5)
}
 0x154   : > { %492 = dma.vmem_to_hbm [thread:$0]  (%p892_p12), %s339_s25, 64, %s341_s21, %s325_s18  }
 0x155 PF: > { %p506_p6 = scmp.ge.s32.totalorder %s786_s22, 2  ;;  %s352_s1 = sand.u32 1, %s746_s12  }
 0x156   : > { %s353_s11 = scalar_lea.sflag [#allocation5], %s352_s1 }
 0x157   : > { %p502_p8 = pnand %p506_p6, %p905_p2 }
 0x159   : > { %p503_p3 = pneg %p502_p8 }
 0x15b   : > { %741 = dma.done.wait (%p503_p3), %s353_s11, 64  }
 0x15c   : > { %743 = vsyncadd (%p503_p3), %s353_s11, 4294967232  ;;  %s22_s22 = sadd.s32 1, %s786_s22   ;;  %s1029_s7 = sld [smem:[#allocation16_spill]] }
 0x15d   : > { %p19_p9 = scmp.ge.s32.totalorder %s22_s22, 6   ;;  %s1030_s18 = sld [smem:[#allocation12_spill]] }
 0x15e   : > { %s1031_s19 = sld [smem:[#allocation13_spill]]  ;;  %s1034_s12 = smov %s750_s13 }
 0x15f   : > { %s1032_s20 = sld [smem:[#allocation14_spill]]  ;;  %s1035_s13 = smov %s754_s14 }
 0x160   : > { %s1033_s21 = sld [smem:[#allocation15_spill]]  ;;  %s1036_s14 = smov %s897_s8 }
 0x161   : > { %s1037_s15 = smov %s762_s16  ;;  %s1038_s16 = smov %s766_s17 }
 0x162   : > { %s1039_s17 = smov %s1029_s7  ;;  %21 = sbr.rel (!%p19_p9) target bundleno = 13 (0xd), region = 101 }
 0x167   :  { %359 = vsyncpa [#allocation4], 1 }
 0x168   :  { %361 = vsyncpa [#allocation4 + $0x1], 1 }
 0x169   :  { %362 = vsyncpa [#allocation7], 1 }
 0x16a   :  { %364 = vsyncpa [#allocation7 + $0x1], 1 }
 0x16b   :  { %365 = vsyncpa [#allocation5], 1 }
 0x16c   :  { %367 = vsyncpa [#allocation5 + $0x1], 1 }

</bundles_post_ra>
